<compile_context>
chip_gen: v7x
topology: tpu7x:2x2x1
jax: 0.10.0
libtpu: 0.0.40
codegen_flags: <defaults>
</compile_context>

<pallas_src>
import jax
import jax.numpy as jnp
from jax.experimental import pallas as pl
from jax.experimental.pallas import tpu as pltpu


def build_grid(resolution):
    """Matches the slot-attention build_grid: (1, H, W, 4) with [gh, gw, 1-gh, 1-gw]."""
    H, W = resolution
    ranges = [jnp.linspace(0.0, 1.0, num=r) for r in (H, W)]
    gh, gw = jnp.meshgrid(*ranges, indexing="ij")          # (H, W) each
    grid = jnp.stack([gh, gw], axis=-1)                    # (H, W, 2)
    grid = grid[None].astype(jnp.float32)                  # (1, H, W, 2)
    return jnp.concatenate([grid, 1.0 - grid], axis=-1)    # (1, H, W, 4)


def soft_pos_embed_kernel(x_ref, wy_ref, wx_ref, b_ref, gh_ref, gw_ref, o_ref):
    # x_ref/o_ref: (C, HWp)   wy/wx/b: (C, 1)   gh/gw: (1, HWp)
    # Two VPU FMAs: sublane-broadcast folded weights x lane-dense grid rows.
    pos = wy_ref[...] * gh_ref[...] + wx_ref[...] * gw_ref[...] + b_ref[...]
    # Add in f32, cast once on the way out.
    o_ref[...] = (x_ref[...] + pos).astype(o_ref.dtype)


def soft_position_embed(x, weight, bias, resolution):
    """x: (B, C, H, W) NCHW; weight: (C, 4) (nn.Linear layout); bias: (C,)."""
    B, C, H, W = x.shape
    HW = H * W
    # Keep the lane dimension a multiple of 128 (no-op for 16x16 = 256).
    HWp = ((HW + 127) // 128) * 128

    x_flat = x.reshape(B, C, HW)
    if HWp != HW:
        x_flat = jnp.pad(x_flat, ((0, 0), (0, 0), (0, HWp - HW)))

    # Fold the 4 grid channels into 2 FMAs (precomputed once in the wrapper).
    wy = (weight[:, 0] - weight[:, 2]).reshape(C, 1)             # coeff for gh
    wx = (weight[:, 1] - weight[:, 3]).reshape(C, 1)             # coeff for gw
    bf = (weight[:, 2] + weight[:, 3] + bias).reshape(C, 1)      # folded bias

    ranges = [jnp.linspace(0.0, 1.0, num=r) for r in (H, W)]
    gh, gw = jnp.meshgrid(*ranges, indexing="ij")
    gh = gh.astype(jnp.float32).reshape(1, HW)
    gw = gw.astype(jnp.float32).reshape(1, HW)
    if HWp != HW:
        gh = jnp.pad(gh, ((0, 0), (0, HWp - HW)))
        gw = jnp.pad(gw, ((0, 0), (0, HWp - HW)))

    out = pl.pallas_call(
        soft_pos_embed_kernel,
        out_shape=jax.ShapeDtypeStruct((B, C, HWp), x.dtype),
        grid_spec=pltpu.PrefetchScalarGridSpec(
            num_scalar_prefetch=0,
            grid=(B,),  # kept as a parallel axis (feeds both TCs on v7x)
            in_specs=[
                pl.BlockSpec((pl.Squeezed(), C, HWp), lambda b: (b, 0, 0)),  # x
                pl.BlockSpec((C, 1), lambda b: (0, 0)),                      # wy (folded)
                pl.BlockSpec((C, 1), lambda b: (0, 0)),                      # wx (folded)
                pl.BlockSpec((C, 1), lambda b: (0, 0)),                      # bias (folded)
                pl.BlockSpec((1, HWp), lambda b: (0, 0)),                    # gh row
                pl.BlockSpec((1, HWp), lambda b: (0, 0)),                    # gw row
            ],
            out_specs=pl.BlockSpec((pl.Squeezed(), C, HWp), lambda b: (b, 0, 0)),
        ),
        compiler_params=pltpu.CompilerParams(
            dimension_semantics=("parallel",),
        ),
        # NOTE: when embedded in a larger jit, input_output_aliases={0: 0}
        # (x_flat -> out) avoids an extra output allocation around the call.
    )(x_flat, wy, wx, bf, gh, gw)

    if HWp != HW:
        out = out[:, :, :HW]
    return out.reshape(B, C, H, W)


if __name__ == "__main__":
    B, hidden, H, W = 2, 32, 16, 16
    resolution = (H, W)

    key = jax.random.PRNGKey(0)
    kx, kw, kb = jax.random.split(key, 3)

    x = jax.random.normal(kx, (B, hidden, H, W), dtype=jnp.float32)
    # Deterministic Linear(4, hidden) params (nn.Linear weight: (hidden, 4), bias: (hidden,))
    weight = jax.random.normal(kw, (hidden, 4), dtype=jnp.float32) * 0.1
    bias = jax.random.normal(kb, (hidden,), dtype=jnp.float32) * 0.1

    out = soft_position_embed(x, weight, bias, resolution)
    out = jax.block_until_ready(out)

    # Pure-JAX reference check (unfolded, matches the PyTorch module exactly)
    grid = build_grid(resolution)                            # (1, H, W, 4)
    pos_ref = jnp.einsum("bhwk,ck->bchw", grid, weight) + bias[None, :, None, None]
    ref = x + pos_ref
    assert jnp.allclose(out, ref, atol=1e-5, rtol=1e-5), "mismatch vs reference"

    print("KERNEL_OK")
</pallas_src>

<mosaic_0001>
module attributes {stable_mosaic.version = 11 : i64} {
  func.func @soft_pos_embed_kernel(%arg0: i32, %arg1: memref<1x32x256xf32, #tpu.memory_space<vmem>>, %arg2: memref<32x1xf32, #tpu.memory_space<vmem>>, %arg3: memref<32x1xf32, #tpu.memory_space<vmem>>, %arg4: memref<32x1xf32, #tpu.memory_space<vmem>>, %arg5: memref<1x256xf32, #tpu.memory_space<vmem>>, %arg6: memref<1x256xf32, #tpu.memory_space<vmem>>, %arg7: memref<1x32x256xf32, #tpu.memory_space<vmem>>) attributes {dimension_semantics = [#tpu.dimension_semantics<parallel>], iteration_bounds = array<i64: 2>, scalar_prefetch = 0 : i64, scratch_operands = 0 : i64, tpu.core_type = #tpu.core_type<tc>, window_params = [{transform_indices = @transform_0, window_bounds = array<i64: 1, 32, 256>}, {pipeline_mode = #tpu.pipeline_mode<synchronous>, transform_indices = @transform_1, window_bounds = array<i64: 32, 1>}, {pipeline_mode = #tpu.pipeline_mode<synchronous>, transform_indices = @transform_2, window_bounds = array<i64: 32, 1>}, {pipeline_mode = #tpu.pipeline_mode<synchronous>, transform_indices = @transform_3, window_bounds = array<i64: 32, 1>}, {pipeline_mode = #tpu.pipeline_mode<synchronous>, transform_indices = @transform_4, window_bounds = array<i64: 1, 256>}, {pipeline_mode = #tpu.pipeline_mode<synchronous>, transform_indices = @transform_5, window_bounds = array<i64: 1, 256>}, {transform_indices = @transform_6, window_bounds = array<i64: 1, 32, 256>}]} {
    %c0 = arith.constant 0 : index
    %c0_0 = arith.constant 0 : index
    %0 = vector.load %arg2[%c0, %c0_0] : memref<32x1xf32, #tpu.memory_space<vmem>>, vector<32x1xf32>
    %c0_1 = arith.constant 0 : index
    %c0_2 = arith.constant 0 : index
    %1 = vector.load %arg5[%c0_1, %c0_2] : memref<1x256xf32, #tpu.memory_space<vmem>>, vector<1x256xf32>
    %2 = vector.broadcast %0 : vector<32x1xf32> to vector<32x256xf32>
    %3 = vector.broadcast %1 : vector<1x256xf32> to vector<32x256xf32>
    %4 = arith.mulf %2, %3 : vector<32x256xf32>
    %c0_3 = arith.constant 0 : index
    %c0_4 = arith.constant 0 : index
    %5 = vector.load %arg3[%c0_3, %c0_4] : memref<32x1xf32, #tpu.memory_space<vmem>>, vector<32x1xf32>
    %c0_5 = arith.constant 0 : index
    %c0_6 = arith.constant 0 : index
    %6 = vector.load %arg6[%c0_5, %c0_6] : memref<1x256xf32, #tpu.memory_space<vmem>>, vector<1x256xf32>
    %7 = vector.broadcast %5 : vector<32x1xf32> to vector<32x256xf32>
    %8 = vector.broadcast %6 : vector<1x256xf32> to vector<32x256xf32>
    %9 = arith.mulf %7, %8 : vector<32x256xf32>
    %10 = arith.addf %4, %9 : vector<32x256xf32>
    %c0_7 = arith.constant 0 : index
    %c0_8 = arith.constant 0 : index
    %11 = vector.load %arg4[%c0_7, %c0_8] : memref<32x1xf32, #tpu.memory_space<vmem>>, vector<32x1xf32>
    %12 = vector.broadcast %11 : vector<32x1xf32> to vector<32x256xf32>
    %13 = arith.addf %10, %12 : vector<32x256xf32>
    %c0_9 = arith.constant 0 : index
    %c0_10 = arith.constant 0 : index
    %c0_11 = arith.constant 0 : index
    %14 = vector.load %arg1[%c0_9, %c0_10, %c0_11] : memref<1x32x256xf32, #tpu.memory_space<vmem>>, vector<1x32x256xf32>
    %15 = vector.shape_cast %14 : vector<1x32x256xf32> to vector<32x256xf32>
    %16 = arith.addf %15, %13 : vector<32x256xf32>
    %c0_12 = arith.constant 0 : index
    %c0_13 = arith.constant 0 : index
    %c0_14 = arith.constant 0 : index
    %17 = vector.load %arg7[%c0_12, %c0_13, %c0_14] : memref<1x32x256xf32, #tpu.memory_space<vmem>>, vector<1x32x256xf32>
    %18 = vector.shape_cast %17 : vector<1x32x256xf32> to vector<32x256xf32>
    %19 = vector.shape_cast %16 : vector<32x256xf32> to vector<1x32x256xf32>
    tpu.vector_store %arg7[%c0_12, %c0_13, %c0_14], %19 {strides = array<i32>} : memref<1x32x256xf32, #tpu.memory_space<vmem>>, vector<1x32x256xf32>,
    return
  }
  func.func @transform_0(%arg0: i32) -> (i32, i32, i32) {
    %c0_i32 = arith.constant 0 : i32
    %c0_i32_0 = arith.constant 0 : i32
    %c0_i32_1 = arith.constant 0 : i32
    return %arg0, %c0_i32, %c0_i32_0 : i32, i32, i32
  }
  func.func @transform_1(%arg0: i32) -> (i32, i32) {
    %c0_i32 = arith.constant 0 : i32
    %c0_i32_0 = arith.constant 0 : i32
    %c0_i32_1 = arith.constant 0 : i32
    return %c0_i32, %c0_i32_0 : i32, i32
  }
  func.func @transform_2(%arg0: i32) -> (i32, i32) {
    %c0_i32 = arith.constant 0 : i32
    %c0_i32_0 = arith.constant 0 : i32
    %c0_i32_1 = arith.constant 0 : i32
    return %c0_i32, %c0_i32_0 : i32, i32
  }
  func.func @transform_3(%arg0: i32) -> (i32, i32) {
    %c0_i32 = arith.constant 0 : i32
    %c0_i32_0 = arith.constant 0 : i32
    %c0_i32_1 = arith.constant 0 : i32
    return %c0_i32, %c0_i32_0 : i32, i32
  }
  func.func @transform_4(%arg0: i32) -> (i32, i32) {
    %c0_i32 = arith.constant 0 : i32
    %c0_i32_0 = arith.constant 0 : i32
    %c0_i32_1 = arith.constant 0 : i32
    return %c0_i32, %c0_i32_0 : i32, i32
  }
  func.func @transform_5(%arg0: i32) -> (i32, i32) {
    %c0_i32 = arith.constant 0 : i32
    %c0_i32_0 = arith.constant 0 : i32
    %c0_i32_1 = arith.constant 0 : i32
    return %c0_i32, %c0_i32_0 : i32, i32
  }
  func.func @transform_6(%arg0: i32) -> (i32, i32, i32) {
    %c0_i32 = arith.constant 0 : i32
    %c0_i32_0 = arith.constant 0 : i32
    %c0_i32_1 = arith.constant 0 : i32
    return %arg0, %c0_i32, %c0_i32_0 : i32, i32, i32
  }
}

</mosaic_0001>

<bundles_post_ra>
// kernel: tpu_custom_call.1
= control target key start
LH: loop header
LB: loop body
LE: loop exit
PB: predicated region body
PF: predicated region fallthrough
CT: control target
= control target key end

     0   :  { %11 = vsyncpa [#allocation3], 0  ;;  %s936_s0 = inlined_call_operand.hbm [shape: f32[2,32,256], index: 0, kind: input, shape index: {}]   ;;  %s937_s1 = inlined_call_operand.vmem [shape: f32[32,1], index: 1, kind: input, shape index: {}]   ;;  %s938_s2 = inlined_call_operand.vmem [shape: f32[32,1], index: 2, kind: input, shape index: {}]   ;;  %s939_s3 = inlined_call_operand.vmem [shape: f32[32,1], index: 3, kind: input, shape index: {}]   ;;  %s940_s4 = inlined_call_operand.vmem [shape: f32[1,256], index: 4, kind: input, shape index: {}]   ;;  %s941_s5 = inlined_call_operand.vmem [shape: f32[1,256], index: 5, kind: input, shape index: {}]   ;;  %s942_s6 = inlined_call_operand.hbm [shape: f32[2,32,256], index: 6, kind: output, shape index: {}]  }
   0x1   :  { %13 = vsyncpa [#allocation3 + $0x1], 0 }
   0x2   :  { %14 = vsyncpa [#allocation4], 0 }
   0x3   :  { %16 = vsyncpa [#allocation4 + $0x1], 0  ;;  %s718_s21 = smov 0   ;;  %s720_s22 = smov 0  }
   0x4   :  { %s722_s23 = smov 0   ;;  %s724_s24 = smov 0  }
   0x5 LB: > { %s739_s25 = sadd.s32 4294967295, %s674_s24   ;;  %s509_s26 = sadd.s32 4294967294, %s674_s24   ;;  %s674_s24 = sphi %s724_s24, %s955_s24   ;;  %s670_s23 = sphi %s722_s23, %s954_s23   ;;  %s666_s22 = sphi %s720_s22, %s953_s22   ;;  %s662_s21 = sphi %s718_s21, %s952_s21  }
   0x6   : > { %s743_s27 = sadd.s32 1, %s674_s24   ;;  %s29_s28 = sadd.s32 1, %s670_s23 }
   0x7   : > { %s26_s29 = ssub.s32 %s674_s24, %s743_s27  ;;  %p36_p0 = scmp.ne.s32.totalorder %s670_s23, %s666_s22 }
   0x8   : > { %p27_p1 = scmp.eq.s32.totalorder %s26_s29, 0  ;;  %p37_p2 = scmp.eq.s32.totalorder %s674_s24, 0 }
   0x9   : > { %p42_p3 = scmp.ne.s32.totalorder %s666_s22, %s662_s21  ;;  %p43_p4 = scmp.eq.s32.totalorder %s739_s25, 0 }
   0xa   : > { %s755_s30 = scalar_select %p27_p1, %s670_s23, %s29_s28  }
   0xb   : > { %p757_p5 = por %p37_p2, %p36_p0  ;;  %p761_p6 = por %p43_p4, %p42_p3 }
   0xc   : > { %p171_p7 = scmp.eq.s32.totalorder %s739_s25, 1  ;;  %p177_p8 = scmp.eq.s32.totalorder %s509_s26, 1 }
   0xd   : > { %p537_p10 = scmp.lt.s32.totalorder %s674_s24, 2  ;;  %s212_s11 = sand.u32 1, %s670_s23  }
   0xe   : > { %p768_p11 = por %p171_p7, %p36_p0  ;;  %p772_p12 = por %p177_p8, %p42_p3 }
   0xf   : > { %s523_s12 = sshll.u32 %s674_s24, 10  ;;  %s512_s13 = sshll.u32 %s212_s11, 6 }
  0x10   : > { %s946_s9 = scalar_select %p768_p11, 1, 0 }
  0x11   : > { %s947_s10 = scalar_select %p772_p12, 1, 0 }
  0x12   : > { %s781_s16 = scalar_lea.hbm %s936_s0, %s523_s12  ;;  %s216_s17 = scalar_lea.vmem [#allocation2], %s512_s13 }
  0x13   : > { %s223_s18 = sshll.u32 %s216_s17, 4  ;;  %p785_p13 = pnand %p537_p10, %p757_p5  ;;  %s789_s18 = int_to_ptr.vmem [resolvable:$true] %s223_s18 }
  0x14   : > { %s791_s20 = scalar_lea.sflag [#allocation3], %s212_s11  ;;  %s578_s26 = scalar_lea.hbm %s781_s16, 1024 }
  0x15   : > { %p579_p0 = scmp.ne.s32.totalorder %s781_s16, %s578_s26  ;;  %p580_p1 = pneg %p785_p13 }
  0x16   : > { %s583_s7 = scalar_lea.hbm %s936_s0, 2048  ;;  %p584_p4 = scmp.lt.u32.totalorder %s781_s16, %s936_s0 }
  0x17   : > { %p581_p2 = pnand %p580_p1, %p579_p0  ;;  %p585_p5 = scmp.lt.u32.totalorder %s583_s7, %s578_s26 }
  0x18   : > { %p587_p8 = scmp.lt.u32.totalorder %s578_s26, %s781_s16 }
  0x19   : > { %p582_p3 = pneg %p581_p2  ;;  %p586_p7 = por %p585_p5, %p584_p4 }
  0x1b   : > { %p588_p10 = por %p587_p8, %p586_p7 }
  0x1d   : > { %p589_p9 = pnand %p588_p10, %p582_p3 }
  0x1f   : > { %592 = shalt.err (!%p589_p9)
}
  0x20   : > { %s593_s11 = scalar_lea.vmem %s789_s18, 1024  ;;  %s676_s14 = smov [#allocation2]  }
  0x21   : > { %p594_p0 = scmp.ne.s32.totalorder %s789_s18, %s593_s11  ;;  %s598_s15 = sshll.u32 %s676_s14, 4  ;;  %s599_s15 = int_to_ptr.vmem [resolvable:$false] %s598_s15 }
  0x22   : > { %s600_s17 = scalar_lea.vmem %s599_s15, 2048  ;;  %p601_p11 = scmp.lt.s32.totalorder %s789_s18, %s599_s15 }
  0x23   : > { %p596_p2 = pnand %p594_p0, %p580_p1  ;;  %p602_p4 = scmp.lt.s32.totalorder %s600_s17, %s593_s11 }
  0x25   : > { %p597_p12 = pneg %p596_p2  ;;  %p603_p5 = por %p602_p4, %p601_p11 }
  0x27   : > { %p604_p7 = pnand %p603_p5, %p597_p12 }
  0x29   : > { %607 = shalt.err (!%p604_p7)
}
  0x2a   : > { %s677_s26 = smov 256   ;;  %s678_s28 = smov 16  }
  0x2b   : > { %532 = dma.hbm_to_vmem [thread:$0]  (!%p785_p13), %s781_s16, 1024, %s789_s18, %s791_s20, %s677_s26, %s677_s26, %s678_s28  }
  0x2c   : > { %p515_p9 = scmp.ge.s32.totalorder %s674_s24, 1  ;;  %p231_p1 = scmp.lt.s32.totalorder %s674_s24, 3 }
  0x2e   : > { %p232_p3 = pnand %p515_p9, %p231_p1 }
  0x2f   : > { %s822_s29 = sand.u32 (!%p232_p3), 1, %s666_s22  }
  0x30   : > { %235 = sbr.rel (%p232_p3) target bundleno = 226 (0xe2), region = 44  ;;  %s516_s7 = sshll.u32 (!%p232_p3), %s822_s29, 6 }
  0x31   : > { %s238_s12 = scalar_lea.sflag (!%p232_p3), [#allocation3], %s822_s29  ;;  %s828_s13 = scalar_lea.vmem (!%p232_p3), [#allocation2], %s516_s7 }
  0x37   : > { %653 = dma.done.wait (%p761_p6), %s238_s12, 1024  }
  0x38   : > { %655 = vsyncadd (%p761_p6), %s238_s12, 4294966272  ;;  %v679_v0 = vmov 0   ;;  %v272_v1 = vld [vmem:[%s937_s1 + $0x10] sm:$0xff]  ;;  %v270_v2 = vld [vmem:[%s937_s1] sm:$0xff]  ;;  %v296_v13 = vlaneseq  ;;  %s524_s11 = sshll.u32 %s739_s25, 10  ;;  %s269_s14 = scalar_lea.vmem [#allocation5], %s516_s7 }
  0x39   : > { %577 = vset.pattern.permute.xlu1 %v679_v0  ;;  %576 = vset.pattern.permute.xlu0 %v679_v0  ;;  %v273_v3 = vld [vmem:[%s937_s1 + $0x18] sm:$0xff]  ;;  %v271_v4 = vld [vmem:[%s937_s1 + $0x8] sm:$0xff]  ;;  %v314_v6 = vld [vmem:[%s938_s2] sm:$0xff]  ;;  %s436_s15 = sshll.u32 %s269_s14, 4  ;;  %s890_s7 = scalar_lea.hbm %s942_s6, %s524_s11  ;;  %s892_s15 = int_to_ptr.vmem [resolvable:$true] %s436_s15 }
  0x3a   : > { %287 = vperm.xlu1 %577, %v272_v1   ;;  %277 = vperm.xlu0 %576, %v270_v2   ;;  %v315_v5 = vld [vmem:[%s938_s2 + $0x8] sm:$0xff]  ;;  %v317_v7 = vld [vmem:[%s938_s2 + $0x18] sm:$0xff]  ;;  %v316_v8 = vld [vmem:[%s938_s2 + $0x10] sm:$0xff]  ;;  %v297_v16 = vshrl.u32 %v296_v13, 7  ;;  %s608_s17 = scalar_lea.vmem %s892_s15, 1024  ;;  %p949_p11 = scmp.ne.s32.totalorder %s946_s9, 0 }
  0x3b   : > { %v367_v9 = vld [vmem:[%s939_s3 + $0x8] sm:$0xff]  ;;  %v366_v10 = vld [vmem:[%s939_s3] sm:$0xff]  ;;  %v369_v11 = vld [vmem:[%s939_s3 + $0x18] sm:$0xff]  ;;  %p609_p6 = scmp.ne.s32.totalorder %s892_s15, %s608_s17  ;;  %s680_s26 = smov [#allocation5]  }
  0x3c   : > { %v368_v12 = vld [vmem:[%s939_s3 + $0x10] sm:$0xff]  ;;  %v318_v19 = vld [vmem:[%s941_s5] sm:$0x3]  ;;  %v298_v20 = vsub.s32 0, %v297_v16  ;;  %v302_v21 = vsub.s32 1, %v297_v16  ;;  %v401_v52 = vld [vmem:[%s828_s13 + $0x18] sm:$0xff] }
  0x3d   : > { %v274_v22 = vld [vmem:[%s940_s4] sm:$0x3]  ;;  %v400_v43 = vld [vmem:[%s828_s13 + $0x10] sm:$0xff]  ;;  %v399_v55 = vld [vmem:[%s828_s13 + $0x8] sm:$0xff]  ;;  %p610_p12 = pnand %p609_p6, %p949_p11  ;;  %s612_s28 = sshll.u32 %s680_s26, 4  ;;  %s613_s28 = int_to_ptr.vmem [resolvable:$false] %s612_s28 }
  0x3e   : > { %292 = vperm.xlu1 %577, %v273_v3   ;;  %282 = vperm.xlu0 %576, %v271_v4   ;;  %v343_v23 = vrot.slane %v318_v19, %v298_v20  ;;  %v347_v24 = vrot.slane %v318_v19, %v302_v21  ;;  %v299_v27 = vrot.slane %v274_v22, %v298_v20  ;;  %v398_v54 = vld [vmem:[%s828_s13] sm:$0xff]  ;;  %s614_s12 = scalar_lea.vmem %s613_s28, 2048  ;;  %p615_p8 = scmp.lt.s32.totalorder %s892_s15, %s613_s28 }
  0x3f   : > { %v303_v28 = vrot.slane %v274_v22, %v302_v21  ;;  %p611_p13 = pneg %p610_p12  ;;  %p616_p10 = scmp.lt.s32.totalorder %s614_s12, %s608_s17 }
  0x41   : > { %p617_p0 = por %p616_p10, %p615_p8 }
  0x42   : > { %326 = vperm.xlu1 %577, %v315_v5   ;;  %321 = vperm.xlu0 %576, %v314_v6   ;;  %v404_v5 = vld [vmem:[%s828_s13 + $0x30] sm:$0xff]  ;;  %v405_v6 = vld [vmem:[%s828_s13 + $0x38] sm:$0xff] }
  0x43   : > { %p618_p2 = pnand %p617_p0, %p611_p13 }
  0x46   : > { %336 = vperm.xlu1 %577, %v317_v7   ;;  %331 = vperm.xlu0 %576, %v316_v8   ;;  %v402_v8 = vld [vmem:[%s828_s13 + $0x20] sm:$0xff] }
  0x4a   : > { %377 = vperm.xlu1 %577, %v367_v9   ;;  %372 = vperm.xlu0 %576, %v366_v10   ;;  %v403_v9 = vld [vmem:[%s828_s13 + $0x28] sm:$0xff]  ;;  %s423_s13 = scalar_lea.sflag [#allocation4], %s822_s29 }
  0x4e   : > { %387 = vperm.xlu1 %577, %v369_v11   ;;  %382 = vperm.xlu0 %576, %v368_v12  }
  0xb9   : > { %v288_v14 = vpop.permute.xlu1 %287  ;;  %v278_v15 = vpop.permute.xlu0 %277 }
  0xba   : > { %v306_v35 = vmul.f32 %v299_v27, %v278_v15  ;;  %v307_v36 = vmul.f32 %v303_v28, %v278_v15  ;;  %v310_v48 = vmul.f32 %v299_v27, %v288_v14  ;;  %v311_v49 = vmul.f32 %v303_v28, %v288_v14 }
  0xbd   : > { %v293_v17 = vpop.permute.xlu1 %292  ;;  %v283_v18 = vpop.permute.xlu0 %282 }
  0xbe   : > { %v308_v37 = vmul.f32 %v299_v27, %v283_v18  ;;  %v309_v38 = vmul.f32 %v303_v28, %v283_v18  ;;  %v312_v50 = vmul.f32 %v299_v27, %v293_v17  ;;  %v313_v51 = vmul.f32 %v303_v28, %v293_v17 }
  0xc1   : > { %v327_v25 = vpop.permute.xlu1 %326  ;;  %v322_v26 = vpop.permute.xlu0 %321 }
  0xc2   : > { %v352_v29 = vmul.f32 %v343_v23, %v327_v25  ;;  %v353_v30 = vmul.f32 %v347_v24, %v327_v25  ;;  %v350_v31 = vmul.f32 %v343_v23, %v322_v26  ;;  %v351_v32 = vmul.f32 %v347_v24, %v322_v26 }
  0xc4   : > { %v360_v44 = vadd.f32 %v352_v29, %v308_v37  ;;  %v361_v45 = vadd.f32 %v353_v30, %v309_v38  ;;  %v358_v46 = vadd.f32 %v350_v31, %v306_v35  ;;  %v359_v47 = vadd.f32 %v351_v32, %v307_v36 }
  0xc5   : > { %v337_v33 = vpop.permute.xlu1 %336  ;;  %v332_v34 = vpop.permute.xlu0 %331 }
  0xc6   : > { %v356_v39 = vmul.f32 %v343_v23, %v337_v33  ;;  %v357_v40 = vmul.f32 %v347_v24, %v337_v33  ;;  %v354_v41 = vmul.f32 %v343_v23, %v332_v34  ;;  %v355_v42 = vmul.f32 %v347_v24, %v332_v34 }
  0xc8   : > { %v364_v61 = vadd.f32 %v356_v39, %v312_v50  ;;  %v365_v62 = vadd.f32 %v357_v40, %v313_v51  ;;  %v362_v63 = vadd.f32 %v354_v41, %v310_v48  ;;  %v363_v0 = vadd.f32 %v355_v42, %v311_v49 }
  0xc9   : > { %v378_v53 = vpop.permute.xlu1 %377  ;;  %v373_v56 = vpop.permute.xlu0 %372 }
  0xca   : > { %v392_v57 = vadd.f32 %v378_v53, %v360_v44  ;;  %v393_v58 = vadd.f32 %v378_v53, %v361_v45  ;;  %v390_v59 = vadd.f32 %v373_v56, %v358_v46  ;;  %v391_v60 = vadd.f32 %v373_v56, %v359_v47 }
  0xcc   : > { %v408_v1 = vadd.f32 %v400_v43, %v392_v57  ;;  %v409_v2 = vadd.f32 %v401_v52, %v393_v58  ;;  %v406_v3 = vadd.f32 %v398_v54, %v390_v59  ;;  %v407_v4 = vadd.f32 %v399_v55, %v391_v60 }
  0xcd   : > { %v388_v7 = vpop.permute.xlu1 %387  ;;  %v383_v10 = vpop.permute.xlu0 %382 }
  0xce   : > { %416 = vst [vmem:[%s269_s14 + $0x10] sm:$0xff] %v408_v1  ;;  %417 = vst [vmem:[%s269_s14 + $0x18] sm:$0xff] %v409_v2  ;;  %v396_v11 = vadd.f32 %v388_v7, %v364_v61  ;;  %v397_v12 = vadd.f32 %v388_v7, %v365_v62  ;;  %v394_v13 = vadd.f32 %v383_v10, %v362_v63 }
  0xcf   : > { %414 = vst [vmem:[%s269_s14] sm:$0xff] %v406_v3  ;;  %415 = vst [vmem:[%s269_s14 + $0x8] sm:$0xff] %v407_v4  ;;  %v395_v14 = vadd.f32 %v383_v10, %v363_v0 }
  0xd0   : > { %v412_v15 = vadd.f32 %v404_v5, %v396_v11  ;;  %v413_v16 = vadd.f32 %v405_v6, %v397_v12  ;;  %v410_v17 = vadd.f32 %v402_v8, %v394_v13 }
  0xd1   : > { %v411_v18 = vadd.f32 %v403_v9, %v395_v14 }
  0xd2   : > { %420 = vst [vmem:[%s269_s14 + $0x30] sm:$0xff] %v412_v15  ;;  %421 = vst [vmem:[%s269_s14 + $0x38] sm:$0xff] %v413_v16 }
  0xd3   : > { %418 = vst [vmem:[%s269_s14 + $0x20] sm:$0xff] %v410_v17  ;;  %419 = vst [vmem:[%s269_s14 + $0x28] sm:$0xff] %v411_v18 }
  0xd4   : > { %621 = shalt.err (!%p618_p2)
}
  0xd5   : > { %s622_s16 = scalar_lea.hbm %s890_s7, 1024  ;;  %s626_s20 = scalar_lea.hbm %s942_s6, 2048 }
  0xd6   : > { %p623_p4 = scmp.ne.s32.totalorder %s890_s7, %s622_s16  ;;  %p627_p9 = scmp.lt.u32.totalorder %s890_s7, %s942_s6 }
  0xd7   : > { %p628_p1 = scmp.lt.u32.totalorder %s626_s20, %s622_s16  ;;  %p630_p6 = scmp.lt.u32.totalorder %s622_s16, %s890_s7 }
  0xd8   : > { %p624_p5 = pnand %p623_p4, %p949_p11 }
  0xd9   : > { %p629_p3 = por %p628_p1, %p627_p9 }
  0xda   : > { %p625_p7 = pneg %p624_p5 }
  0xdb   : > { %p631_p12 = por %p630_p6, %p629_p3 }
  0xdd   : > { %p632_p13 = pnand %p631_p12, %p625_p7 }
  0xdf   : > { %635 = shalt.err (!%p632_p13)
}
  0xe0   : > { %s681_s8 = smov 256   ;;  %s682_s25 = smov 16  }
  0xe1   : > { %527 = dma.vmem_to_hbm [thread:$0]  (%p949_p11), %s892_s15, 1024, %s890_s7, %s423_s13, %s681_s8, %s681_s8, %s682_s25  }
  0xe2 PF: > { %s451_s17 = sand.u32 1, %s662_s21   ;;  %p950_p8 = scmp.ne.s32.totalorder %s947_s10, 0 }
  0xe3   : > { %p951_p10 = scmp.ge.s32.totalorder %s674_s24, 2  ;;  %s452_s26 = scalar_lea.sflag [#allocation4], %s451_s17 }
  0xe5   : > { %p534_p0 = pnand %p951_p10, %p950_p8 }
  0xe7   : > { %657 = dma.done.wait (!%p534_p0), %s452_s26, 1024  }
  0xe8   : > { %659 = vsyncadd (!%p534_p0), %s452_s26, 4294966272  ;;  %p19_p2 = scmp.ge.s32.totalorder %s743_s27, 4   ;;  %s952_s21 = smov %s666_s22 }
  0xe9   : > { %s953_s22 = smov %s670_s23  ;;  %s954_s23 = smov %s755_s30 }
  0xea   : > { %s955_s24 = smov %s743_s27  ;;  %21 = sbr.rel (!%p19_p2) target bundleno = 5 (0x5), region = 89 }
  0xf1   :  { %457 = vsyncpa [#allocation3], 1 }
  0xf2   :  { %459 = vsyncpa [#allocation3 + $0x1], 1 }
  0xf3   :  { %460 = vsyncpa [#allocation4], 1 }
  0xf4   :  { %462 = vsyncpa [#allocation4 + $0x1], 1 }

</bundles_post_ra>
